<compile_context>
chip_gen: v6e
topology: v6e:2x2x1
jax: 0.10.0
libtpu: 0.0.40
codegen_flags: <defaults>
</compile_context>

<pallas_src>
import jax
import jax.numpy as jnp
from jax.experimental import pallas as pl
from jax.experimental.pallas import tpu as pltpu


def _round_up(x, m):
    return ((x + m - 1) // m) * m


# ---------------------------------------------------------------------------
# Kernel
# ---------------------------------------------------------------------------
def critic_kernel(pre_ref, st_ref, act_ref, w1_ref, w2_ref, wh_ref, b_ref, out_ref):
    # Static dims (from ref shapes, known at trace time).
    S = pre_ref.shape[1]              # state_dim
    h1_dim = w1_ref.shape[1]          # state_dim * 8
    dig_dim = w2_ref.shape[1]         # 32
    a_pad = act_ref.shape[1]          # action_dim rounded up to 8
    hid = wh_ref.shape[1]             # 64
    o4 = dig_dim + a_pad              # row offset of the w4 row inside head slab

    cdt = w1_ref.dtype                # compute dtype for MXU operands

    # Biases: one packed [32, W] slab, each bias on its own 8-sublane group
    # (rows 0 / 8 / 16 / 24) so the slices are tile-aligned.
    b1 = b_ref[0:1, 0:h1_dim]
    b2 = b_ref[8:9, 0:dig_dim]
    b3 = b_ref[16:17, 0:hid]
    b4 = b_ref[24:25, 0:1]

    # In-kernel cast (identity for the f32 path).
    pre = pre_ref[...].astype(cdt)
    st = st_ref[...].astype(cdt)
    act = act_ref[...].astype(cdt)

    # --- State sub-module ---
    # fc1 on concat(pre_state, state): two dots over sublane-aligned row
    # slices of w1 (avoids a wrapper-side concat HBM pass).
    h1 = (jnp.dot(pre, w1_ref[0:S, :], preferred_element_type=jnp.float32)
          + jnp.dot(st, w1_ref[S:2 * S, :], preferred_element_type=jnp.float32)
          + b1)
    h1 = jnp.maximum(h1, 0.0).astype(cdt)                       # relu

    # fc2_state: 8S -> digest
    dig = jnp.dot(h1, w2_ref[...], preferred_element_type=jnp.float32) + b2
    dig = jnp.maximum(dig, 0.0).astype(cdt)                     # relu

    # --- Critic head ---
    # fc2 on concat(digest, action): digest part (K=32) + zero-padded action
    # part (K=a_pad) from the packed head-weight slab.
    h2 = (jnp.dot(dig, wh_ref[0:dig_dim, :], preferred_element_type=jnp.float32)
          + jnp.dot(act, wh_ref[dig_dim:o4, :], preferred_element_type=jnp.float32)
          + b3)
    h2 = jnp.maximum(h2, 0.0)                                   # relu (f32 epilogue)

    # fc3 (64 -> 1): VPU multiply + XLU lane reduction (not a 1-lane MXU matmul).
    w4_row = wh_ref[o4:o4 + 1, :].astype(jnp.float32)           # [1, 64]
    q = jnp.sum(h2 * w4_row, axis=-1, keepdims=True) + b4
    out_ref[...] = q.astype(out_ref.dtype)


# ---------------------------------------------------------------------------
# Parameter packing (call once; weights are constant across RL steps)
# ---------------------------------------------------------------------------
def pack_params(p, dtype=jnp.float32):
    """Pack 8 PyTorch-shaped tensors into 4 kernel operands (fewer tiny DMAs)."""
    h1 = p["w1"].shape[1]
    dig = p["w2"].shape[1]
    hid = p["w3"].shape[1]
    action_dim = p["w3"].shape[0] - dig
    a_pad = _round_up(action_dim, 8)

    # Static slab offsets assume an 8-row-aligned digest (true for dig=32).
    assert dig % 8 == 0, "state_digest_dim must be a multiple of 8 for aligned slices"

    # Head slab [dig + a_pad + 8, hid]: w3_digest | w3_action (zero-padded) | w4 row.
    w3_dig = p["w3"][:dig, :]
    w3_act = jnp.zeros((a_pad, hid), jnp.float32).at[:action_dim, :].set(p["w3"][dig:, :])
    w4_row = jnp.zeros((8, hid), jnp.float32).at[0:1, :].set(p["w4"].T)
    wh = jnp.concatenate([w3_dig, w3_act, w4_row], axis=0).astype(dtype)

    # Bias slab [32, W]: bias of layer r on sublane-group boundary row 8*r.
    W = max(h1, 128)
    biases = jnp.zeros((32, W), jnp.float32)
    biases = biases.at[0:1, : p["b1"].shape[1]].set(p["b1"])
    biases = biases.at[8:9, : p["b2"].shape[1]].set(p["b2"])
    biases = biases.at[16:17, : p["b3"].shape[1]].set(p["b3"])
    biases = biases.at[24:25, : p["b4"].shape[1]].set(p["b4"])

    return {
        "w1": p["w1"].astype(dtype),     # [2S, 8S]
        "w2": p["w2"].astype(dtype),     # [8S, dig]
        "wh": wh,                        # [dig + a_pad + 8, 64]
        "b": biases,                     # [32, W] f32
        "a_pad": a_pad,
    }


# ---------------------------------------------------------------------------
# Batch-tile selection
# ---------------------------------------------------------------------------
def _choose_batch_tile(B, *, max_tile=2048, min_tiles=2):
    """Multiple-of-8 batch tile: as large as possible (amortize per-step
    overhead), capped at max_tile, and yielding >= min_tiles grid steps once B
    is big enough so the batch axis can shard across v7x's 2 TensorCores."""
    b8 = _round_up(B, 8)
    if b8 <= 8 * min_tiles:
        return b8
    n_tiles = max(min_tiles, pl.cdiv(b8, max_tile))
    return _round_up(pl.cdiv(b8, n_tiles), 8)


# ---------------------------------------------------------------------------
# Wrapper
# ---------------------------------------------------------------------------
def critic_forward(pre_state, state, action, packed):
    B, S = pre_state.shape
    A = action.shape[1]
    a_pad = packed["a_pad"]

    assert state.shape == (B, S) and action.shape[0] == B
    # TODO(synk): for state_dim not a multiple of 8, fall back to a wrapper-side
    # concat (the in-kernel w1 row slices below assume sublane alignment).
    assert S % 8 == 0, "state_dim must be a multiple of 8"

    # Action: lane-pad to a_pad (tiny: B x a_pad). For production, store the
    # replay-buffer action pre-padded upstream to avoid even this pass.
    act = action
    if a_pad != A:
        act = jnp.pad(act, ((0, 0), (0, a_pad - A)))

    TB = _choose_batch_tile(B)
    n_tiles = pl.cdiv(B, TB)

    S2, h1 = packed["w1"].shape
    dig = packed["w2"].shape[1]
    wh_rows, hid = packed["wh"].shape
    bW = packed["b"].shape[1]

    out = pl.pallas_call(
        critic_kernel,
        out_shape=jax.ShapeDtypeStruct((B, 1), jnp.float32),
        grid_spec=pltpu.PrefetchScalarGridSpec(
            num_scalar_prefetch=0,
            grid=(n_tiles,),
            in_specs=[
                # Activations: blocked over batch (partial last block is
                # boundary-masked by Pallas; rows are independent).
                pl.BlockSpec((TB, S), lambda i: (i, 0)),       # pre_state
                pl.BlockSpec((TB, S), lambda i: (i, 0)),       # state
                pl.BlockSpec((TB, a_pad), lambda i: (i, 0)),   # action (padded)
                # Weights / biases: constant block index -> VMEM-resident
                # across all grid steps (no re-DMA per batch tile).
                pl.BlockSpec((S2, h1), lambda i: (0, 0)),
                pl.BlockSpec((h1, dig), lambda i: (0, 0)),
                pl.BlockSpec((wh_rows, hid), lambda i: (0, 0)),
                pl.BlockSpec((32, bW), lambda i: (0, 0)),
            ],
            out_specs=pl.BlockSpec((TB, 1), lambda i: (i, 0)),
        ),
        compiler_params=pltpu.CompilerParams(
            # Batch axis is independent: v7x shards it over both TensorCores.
            dimension_semantics=("parallel",),
        ),
    )(pre_state, state, act, packed["w1"], packed["w2"], packed["wh"], packed["b"])
    return out


# ---------------------------------------------------------------------------
# Synthetic init + plain-JAX reference
# ---------------------------------------------------------------------------
def init_params(key, state_dim, action_dim, digest_dim=32):
    """Deterministic synthetic parameters matching the PyTorch module's shapes."""
    h1 = state_dim * 8
    ks = jax.random.split(key, 8)
    f32 = jnp.float32

    def nrm(k, shape):  # matches .normal_(0, 0.1) for weights
        return 0.1 * jax.random.normal(k, shape, dtype=f32)

    def unif(k, shape, fan_in):  # PyTorch default bias init
        bound = 1.0 / jnp.sqrt(fan_in)
        return jax.random.uniform(k, shape, dtype=f32, minval=-bound, maxval=bound)

    return {
        # State.fc1: 2S -> 8S
        "w1": nrm(ks[0], (2 * state_dim, h1)),
        "b1": unif(ks[1], (1, h1), 2 * state_dim),
        # State.fc2: 8S -> digest
        "w2": nrm(ks[2], (h1, digest_dim)),
        "b2": unif(ks[3], (1, digest_dim), h1),
        # Critic.fc2: digest + A -> 64
        "w3": nrm(ks[4], (digest_dim + action_dim, 64)),
        "b3": unif(ks[5], (1, 64), digest_dim + action_dim),
        # Critic.fc3: 64 -> 1
        "w4": nrm(ks[6], (64, 1)),
        "b4": unif(ks[7], (1, 1), 64),
    }


def critic_reference(pre_state, state, action, p):
    x = jnp.concatenate([pre_state, state], axis=1)
    h1 = jax.nn.relu(x @ p["w1"] + p["b1"])
    dig = jax.nn.relu(h1 @ p["w2"] + p["b2"])
    q_in = jnp.concatenate([dig, action], axis=1)
    h2 = jax.nn.relu(q_in @ p["w3"] + p["b3"])
    return h2 @ p["w4"] + p["b4"]


if __name__ == "__main__":
    B, STATE_DIM, ACTION_DIM = 8, 16, 4

    key = jax.random.PRNGKey(0)
    k_pre, k_st, k_act, k_par = jax.random.split(key, 4)

    pre_state = jax.random.normal(k_pre, (B, STATE_DIM), dtype=jnp.float32)
    state = jax.random.normal(k_st, (B, STATE_DIM), dtype=jnp.float32)
    action = jax.random.normal(k_act, (B, ACTION_DIM), dtype=jnp.float32)

    params = init_params(k_par, STATE_DIM, ACTION_DIM)
    # Pack once (weights are constant across RL steps). dtype=jnp.bfloat16 is a
    # valid MXU operand dtype on v5e/v6e/v7x for large-batch throughput, but the
    # exact allclose check below is only meaningful for the f32 path.
    compute_dtype = jnp.float32
    packed = pack_params(params, dtype=compute_dtype)

    q = critic_forward(pre_state, state, action, packed)
    q = jax.block_until_ready(q)

    q_ref = critic_reference(pre_state, state, action, params)
    assert q.shape == (B, 1)
    if compute_dtype == jnp.float32:
        assert jnp.allclose(q, q_ref, atol=1e-4, rtol=1e-4), "mismatch vs reference"

    print("KERNEL_OK")
</pallas_src>

<mosaic_0001>
module attributes {stable_mosaic.version = 11 : i64} {
  func.func @critic_kernel(%arg0: i32, %arg1: memref<8x16xf32, #tpu.memory_space<vmem>>, %arg2: memref<8x16xf32, #tpu.memory_space<vmem>>, %arg3: memref<8x8xf32, #tpu.memory_space<vmem>>, %arg4: memref<32x128xf32, #tpu.memory_space<vmem>>, %arg5: memref<128x32xf32, #tpu.memory_space<vmem>>, %arg6: memref<48x64xf32, #tpu.memory_space<vmem>>, %arg7: memref<32x128xf32, #tpu.memory_space<vmem>>, %arg8: memref<8x1xf32, #tpu.memory_space<vmem>>) attributes {dimension_semantics = [#tpu.dimension_semantics<parallel>], iteration_bounds = array<i64: 1>, scalar_prefetch = 0 : i64, scratch_operands = 0 : i64, tpu.core_type = #tpu.core_type<tc>, window_params = [{transform_indices = @transform_0, window_bounds = array<i64: 8, 16>}, {transform_indices = @transform_1, window_bounds = array<i64: 8, 16>}, {transform_indices = @transform_2, window_bounds = array<i64: 8, 8>}, {pipeline_mode = #tpu.pipeline_mode<synchronous>, transform_indices = @transform_3, window_bounds = array<i64: 32, 128>}, {pipeline_mode = #tpu.pipeline_mode<synchronous>, transform_indices = @transform_4, window_bounds = array<i64: 128, 32>}, {pipeline_mode = #tpu.pipeline_mode<synchronous>, transform_indices = @transform_5, window_bounds = array<i64: 48, 64>}, {pipeline_mode = #tpu.pipeline_mode<synchronous>, transform_indices = @transform_6, window_bounds = array<i64: 32, 128>}, {transform_indices = @transform_7, window_bounds = array<i64: 8, 1>}]} {
    %c0 = arith.constant 0 : index
    %c0_0 = arith.constant 0 : index
    %0 = vector.load %arg7[%c0, %c0_0] : memref<32x128xf32, #tpu.memory_space<vmem>>, vector<1x128xf32>
    %c8 = arith.constant 8 : index
    %c0_1 = arith.constant 0 : index
    %1 = vector.load %arg7[%c8, %c0_1] : memref<32x128xf32, #tpu.memory_space<vmem>>, vector<1x32xf32>
    %c16 = arith.constant 16 : index
    %c0_2 = arith.constant 0 : index
    %2 = vector.load %arg7[%c16, %c0_2] : memref<32x128xf32, #tpu.memory_space<vmem>>, vector<1x64xf32>
    %c24 = arith.constant 24 : index
    %c0_3 = arith.constant 0 : index
    %3 = vector.load %arg7[%c24, %c0_3] : memref<32x128xf32, #tpu.memory_space<vmem>>, vector<1x1xf32>
    %c0_4 = arith.constant 0 : index
    %c0_5 = arith.constant 0 : index
    %4 = vector.load %arg1[%c0_4, %c0_5] : memref<8x16xf32, #tpu.memory_space<vmem>>, vector<8x16xf32>
    %c0_6 = arith.constant 0 : index
    %c0_7 = arith.constant 0 : index
    %5 = vector.load %arg2[%c0_6, %c0_7] : memref<8x16xf32, #tpu.memory_space<vmem>>, vector<8x16xf32>
    %c0_8 = arith.constant 0 : index
    %c0_9 = arith.constant 0 : index
    %6 = vector.load %arg3[%c0_8, %c0_9] : memref<8x8xf32, #tpu.memory_space<vmem>>, vector<8x8xf32>
    %c0_10 = arith.constant 0 : index
    %c0_11 = arith.constant 0 : index
    %7 = vector.load %arg4[%c0_10, %c0_11] : memref<32x128xf32, #tpu.memory_space<vmem>>, vector<16x128xf32>
    %cst = arith.constant dense<0.000000e+00> : vector<8x128xf32>
    %8 = tpu.matmul %4, %7, %cst {dimension_numbers = #tpu.dot_dimension_numbers<[1], [0], [0], [1], [0, 0, 1, 1], [], []>} : vector<8x16xf32>, vector<16x128xf32>, vector<8x128xf32> -> vector<8x128xf32>
    %c16_12 = arith.constant 16 : index
    %c0_13 = arith.constant 0 : index
    %9 = vector.load %arg4[%c16_12, %c0_13] : memref<32x128xf32, #tpu.memory_space<vmem>>, vector<16x128xf32>
    %cst_14 = arith.constant dense<0.000000e+00> : vector<8x128xf32>
    %10 = tpu.matmul %5, %9, %cst_14 {dimension_numbers = #tpu.dot_dimension_numbers<[1], [0], [0], [1], [0, 0, 1, 1], [], []>} : vector<8x16xf32>, vector<16x128xf32>, vector<8x128xf32> -> vector<8x128xf32>
    %11 = arith.addf %8, %10 : vector<8x128xf32>
    %12 = vector.broadcast %0 : vector<1x128xf32> to vector<8x128xf32>
    %13 = arith.addf %11, %12 : vector<8x128xf32>
    %cst_15 = arith.constant 0.000000e+00 : f32
    %14 = vector.broadcast %cst_15 : f32 to vector<8x128xf32>
    %15 = arith.maximumf %13, %14 : vector<8x128xf32>
    %c0_16 = arith.constant 0 : index
    %c0_17 = arith.constant 0 : index
    %16 = vector.load %arg5[%c0_16, %c0_17] : memref<128x32xf32, #tpu.memory_space<vmem>>, vector<128x32xf32>
    %cst_18 = arith.constant dense<0.000000e+00> : vector<8x32xf32>
    %17 = tpu.matmul %15, %16, %cst_18 {dimension_numbers = #tpu.dot_dimension_numbers<[1], [0], [0], [1], [0, 0, 1, 1], [], []>} : vector<8x128xf32>, vector<128x32xf32>, vector<8x32xf32> -> vector<8x32xf32>
    %18 = vector.broadcast %1 : vector<1x32xf32> to vector<8x32xf32>
    %19 = arith.addf %17, %18 : vector<8x32xf32>
    %cst_19 = arith.constant 0.000000e+00 : f32
    %20 = vector.broadcast %cst_19 : f32 to vector<8x32xf32>
    %21 = arith.maximumf %19, %20 : vector<8x32xf32>
    %c0_20 = arith.constant 0 : index
    %c0_21 = arith.constant 0 : index
    %22 = vector.load %arg6[%c0_20, %c0_21] : memref<48x64xf32, #tpu.memory_space<vmem>>, vector<32x64xf32>
    %cst_22 = arith.constant dense<0.000000e+00> : vector<8x64xf32>
    %23 = tpu.matmul %21, %22, %cst_22 {dimension_numbers = #tpu.dot_dimension_numbers<[1], [0], [0], [1], [0, 0, 1, 1], [], []>} : vector<8x32xf32>, vector<32x64xf32>, vector<8x64xf32> -> vector<8x64xf32>
    %c32 = arith.constant 32 : index
    %c0_23 = arith.constant 0 : index
    %24 = vector.load %arg6[%c32, %c0_23] : memref<48x64xf32, #tpu.memory_space<vmem>>, vector<8x64xf32>
    %cst_24 = arith.constant dense<0.000000e+00> : vector<8x64xf32>
    %25 = tpu.matmul %6, %24, %cst_24 {dimension_numbers = #tpu.dot_dimension_numbers<[1], [0], [0], [1], [0, 0, 1, 1], [], []>} : vector<8x8xf32>, vector<8x64xf32>, vector<8x64xf32> -> vector<8x64xf32>
    %26 = arith.addf %23, %25 : vector<8x64xf32>
    %27 = vector.broadcast %2 : vector<1x64xf32> to vector<8x64xf32>
    %28 = arith.addf %26, %27 : vector<8x64xf32>
    %cst_25 = arith.constant 0.000000e+00 : f32
    %29 = vector.broadcast %cst_25 : f32 to vector<8x64xf32>
    %30 = arith.maximumf %28, %29 : vector<8x64xf32>
    %c40 = arith.constant 40 : index
    %c0_26 = arith.constant 0 : index
    %31 = vector.load %arg6[%c40, %c0_26] : memref<48x64xf32, #tpu.memory_space<vmem>>, vector<1x64xf32>
    %32 = vector.broadcast %31 : vector<1x64xf32> to vector<8x64xf32>
    %33 = arith.mulf %30, %32 : vector<8x64xf32>
    %cst_27 = arith.constant dense<0.000000e+00> : vector<8xf32>
    %34 = vector.multi_reduction <add>, %33, %cst_27 [1] : vector<8x64xf32> to vector<8xf32>
    %35 = vector.shape_cast %34 : vector<8xf32> to vector<8x1xf32>
    %36 = vector.broadcast %3 : vector<1x1xf32> to vector<8x1xf32>
    %37 = arith.addf %35, %36 : vector<8x1xf32>
    %c0_28 = arith.constant 0 : index
    %c0_29 = arith.constant 0 : index
    %38 = vector.load %arg8[%c0_28, %c0_29] : memref<8x1xf32, #tpu.memory_space<vmem>>, vector<8x1xf32>
    tpu.vector_store %arg8[%c0_28, %c0_29], %37 {strides = array<i32>} : memref<8x1xf32, #tpu.memory_space<vmem>>, vector<8x1xf32>,
    return
  }
  func.func @transform_0(%arg0: i32) -> (i32, i32) {
    %c0_i32 = arith.constant 0 : i32
    %c0_i32_0 = arith.constant 0 : i32
    return %arg0, %c0_i32 : i32, i32
  }
  func.func @transform_1(%arg0: i32) -> (i32, i32) {
    %c0_i32 = arith.constant 0 : i32
    %c0_i32_0 = arith.constant 0 : i32
    return %arg0, %c0_i32 : i32, i32
  }
  func.func @transform_2(%arg0: i32) -> (i32, i32) {
    %c0_i32 = arith.constant 0 : i32
    %c0_i32_0 = arith.constant 0 : i32
    return %arg0, %c0_i32 : i32, i32
  }
  func.func @transform_3(%arg0: i32) -> (i32, i32) {
    %c0_i32 = arith.constant 0 : i32
    %c0_i32_0 = arith.constant 0 : i32
    %c0_i32_1 = arith.constant 0 : i32
    return %c0_i32, %c0_i32_0 : i32, i32
  }
  func.func @transform_4(%arg0: i32) -> (i32, i32) {
    %c0_i32 = arith.constant 0 : i32
    %c0_i32_0 = arith.constant 0 : i32
    %c0_i32_1 = arith.constant 0 : i32
    return %c0_i32, %c0_i32_0 : i32, i32
  }
  func.func @transform_5(%arg0: i32) -> (i32, i32) {
    %c0_i32 = arith.constant 0 : i32
    %c0_i32_0 = arith.constant 0 : i32
    %c0_i32_1 = arith.constant 0 : i32
    return %c0_i32, %c0_i32_0 : i32, i32
  }
  func.func @transform_6(%arg0: i32) -> (i32, i32) {
    %c0_i32 = arith.constant 0 : i32
    %c0_i32_0 = arith.constant 0 : i32
    %c0_i32_1 = arith.constant 0 : i32
    return %c0_i32, %c0_i32_0 : i32, i32
  }
  func.func @transform_7(%arg0: i32) -> (i32, i32) {
    %c0_i32 = arith.constant 0 : i32
    %c0_i32_0 = arith.constant 0 : i32
    return %arg0, %c0_i32 : i32, i32
  }
}

</mosaic_0001>

<bundles_post_ra>
// kernel: tpu_custom_call.1
= control target key start
LH: loop header
LB: loop body
LE: loop exit
PB: predicated region body
PF: predicated region fallthrough
CT: control target
= control target key end

     0   :  { %v567_v0 = vmov 0.0   ;;  %vm568_vm0 = vmmov 0   ;;  %vm37_vm1 = vcmask 130048   ;;  %vm286_vm2 = vcmask 64512   ;;  %s748_s3 = inlined_call_operand.vmem [shape: f32[32,128], index: 3, kind: input, shape index: {}]   ;;  %s749_s1 = inlined_call_operand.vmem [shape: f32[8,16], index: 1, kind: input, shape index: {}]   ;;  %s750_s4 = inlined_call_operand.vmem [shape: f32[128,32], index: 4, kind: input, shape index: {}]   ;;  %s751_s0 = inlined_call_operand.vmem [shape: f32[8,16], index: 0, kind: input, shape index: {}]   ;;  %s752_s5 = inlined_call_operand.vmem [shape: f32[48,64], index: 5, kind: input, shape index: {}]   ;;  %s753_s2 = inlined_call_operand.vmem [shape: f32[8,8], index: 2, kind: input, shape index: {}]   ;;  %s754_s6 = inlined_call_operand.vmem [shape: f32[32,128], index: 6, kind: input, shape index: {}]   ;;  %s755_s7 = inlined_call_operand.vmem [shape: f32[8,1], index: 7, kind: output, shape index: {}]  }
   0x1   :  { %500 = vmatprep.subr.mxu1 %v567_v0  ;;  %v36_v1 = vld [vmem:[%s748_s3 + $0x18] sm:$0xff]  ;;  %v35_v2 = vld [vmem:[%s748_s3 + $0x10] sm:$0xff]  ;;  %504 = vmatprep.mubr.msk.f32.mxu1 %vm568_vm0, %v567_v0  ;;  %v31_v3 = vld [vmem:[%s749_s1] sm:$0xff]  ;;  %vm360_vm3 = vcmask 261120   ;;  %vm446_vm4 = vcmask 523264   ;;  %vm455_vm5 = vcmask 7168  }
   0x2   :  { %501 = vmatpush3.msra.mxu1 %v36_v1  ;;  %514 = vmatprep.subr.mxu0 %v567_v0  ;;  %v34_v4 = vld [vmem:[%s748_s3 + $0x8] sm:$0xff]  ;;  %v205_v5 = vld [vmem:[%s750_s4 + $0x78] sm:$0xff]  ;;  %v33_v6 = vld [vmem:[%s748_s3] sm:$0xff] }
   0x3   :  { %502 = vmatprep.subr.mxu1 %v567_v0  ;;  %546 = vmatprep.mubr.msk.f32.mxu0 %vm568_vm0, %v567_v0  ;;  %v204_v7 = vld [vmem:[%s750_s4 + $0x70] sm:$0xff]  ;;  %v30_v8 = vld [vmem:[%s751_s0] sm:$0xff]  ;;  %v203_v9 = vld [vmem:[%s750_s4 + $0x68] sm:$0xff] }
   0x4   :  { %503 = vmatpush3.msra.mxu1 %v35_v2  ;;  %515 = vmatpush3.msra.mxu0 %v205_v5  ;;  %v202_v10 = vld [vmem:[%s750_s4 + $0x60] sm:$0xff]  ;;  %v201_v11 = vld [vmem:[%s750_s4 + $0x58] sm:$0xff]  ;;  %v200_v12 = vld [vmem:[%s750_s4 + $0x50] sm:$0xff] }
   0x5   :  { %505 = vmatmul.mubr.msk.f32.vlgmr.msra.gmra.mxu1 %vm37_vm1, %v31_v3  ;;  %507 = vmatprep.subr.mxu1 %v567_v0  ;;  %v199_v13 = vld [vmem:[%s750_s4 + $0x48] sm:$0xff]  ;;  %v198_v14 = vld [vmem:[%s750_s4 + $0x40] sm:$0xff]  ;;  %v197_v15 = vld [vmem:[%s750_s4 + $0x38] sm:$0xff] }
   0x6   :  { %508 = vmatpush3.msra.mxu1 %v34_v4  ;;  %511 = vmatprep.mubr.msk.f32.mxu1 %vm568_vm0, %v567_v0  ;;  %v196_v16 = vld [vmem:[%s750_s4 + $0x30] sm:$0xff]  ;;  %v195_v17 = vld [vmem:[%s750_s4 + $0x28] sm:$0xff]  ;;  %v194_v18 = vld [vmem:[%s750_s4 + $0x20] sm:$0xff] }
   0x7   :  { %509 = vmatprep.subr.mxu1 %v567_v0  ;;  %516 = vmatprep.subr.mxu0 %v567_v0  ;;  %v193_v19 = vld [vmem:[%s750_s4 + $0x18] sm:$0xff]  ;;  %v192_v20 = vld [vmem:[%s750_s4 + $0x10] sm:$0xff]  ;;  %v191_v21 = vld [vmem:[%s750_s4 + $0x8] sm:$0xff] }
   0x8   :  { %510 = vmatpush3.msra.mxu1 %v33_v6  ;;  %517 = vmatpush3.msra.mxu0 %v204_v7  ;;  %v190_v22 = vld [vmem:[%s750_s4] sm:$0xff]  ;;  %v284_v25 = vld [vmem:[%s752_s5 + $0x18] sm:$0xff]  ;;  %v283_v34 = vld [vmem:[%s752_s5 + $0x10] sm:$0xff] }
   0x9   :  { %512 = vmatmul.mubr.msk.f32.vlgmr.msra.gmra.mxu1 %vm37_vm1, %v30_v8  ;;  %518 = vmatprep.subr.mxu0 %v567_v0  ;;  %v285_v23 = vld [vmem:[%s752_s5 + $0x20] sm:$0xff]  ;;  %v282_v35 = vld [vmem:[%s752_s5 + $0x8] sm:$0xff]  ;;  %v467_v44 = vld [vmem:[%s754_s6 + $0x10] ss:$0 sm:$0xff] }
   0xa   :  { %519 = vmatpush3.msra.mxu0 %v203_v9  ;;  %549 = vmatprep.subr.mxu1 %v567_v0  ;;  %v32_v24 = vld [vmem:[%s753_s2] sm:$0xff]  ;;  %v464_v39 = vld [vmem:[%s754_s6 + $0x8] ss:$0 sm:$0xff]  ;;  %v469_v53 = vld [vmem:[%s754_s6 + $0x18] ss:$0 sm:$0xff] }
   0xb   :  { %520 = vmatprep.subr.mxu0 %v567_v0  ;;  %551 = vmatprep.mubr.msk.f32.mxu1 %vm568_vm0, %v567_v0  ;;  %v463_v28 = vld [vmem:[%s754_s6] ss:$0 sm:$0xff]  ;;  %v468_v49 = vld [vmem:[%s752_s5 + $0x28] ss:$0 sm:$0xff] }
   0xc   :  { %521 = vmatpush3.msra.mxu0 %v202_v10  ;;  %550 = vmatpush3.msra.mxu1 %v285_v23  ;;  %v281_v36 = vld [vmem:[%s752_s5] sm:$0xff] }
   0xd   :  { %522 = vmatprep.subr.mxu0 %v567_v0  ;;  %552 = vmatmul.mubr.msk.f32.vlgmr.msra.gmra.mxu1 %vm286_vm2, %v32_v24 }
   0xe   :  { %523 = vmatpush3.msra.mxu0 %v201_v11  ;;  %554 = vmatprep.subr.mxu1 %v567_v0 }
   0xf   :  { %524 = vmatprep.subr.mxu0 %v567_v0  ;;  %555 = vmatpush3.msra.mxu1 %v284_v25 }
  0x10   :  { %525 = vmatpush3.msra.mxu0 %v200_v12  ;;  %562 = vmatprep.mubr.msk.f32.mxu1 %vm568_vm0, %v567_v0 }
  0x11   :  { %526 = vmatprep.subr.mxu0 %v567_v0  ;;  %556 = vmatprep.subr.mxu1 %v567_v0 }
  0x12   :  { %527 = vmatpush3.msra.mxu0 %v199_v13  ;;  %557 = vmatpush3.msra.mxu1 %v283_v34 }
  0x13   :  { %528 = vmatprep.subr.mxu0 %v567_v0  ;;  %558 = vmatprep.subr.mxu1 %v567_v0 }
  0x14   :  { %529 = vmatpush3.msra.mxu0 %v198_v14  ;;  %559 = vmatpush3.msra.mxu1 %v282_v35 }
  0x15   :  { %530 = vmatprep.subr.mxu0 %v567_v0  ;;  %560 = vmatprep.subr.mxu1 %v567_v0 }
  0x16   :  { %531 = vmatpush3.msra.mxu0 %v197_v15  ;;  %561 = vmatpush3.msra.mxu1 %v281_v36 }
  0x17   :  { %532 = vmatprep.subr.mxu0 %v567_v0 }
  0x18   :  { %533 = vmatpush3.msra.mxu0 %v196_v16 }
  0x19   :  { %534 = vmatprep.subr.mxu0 %v567_v0 }
  0x1a   :  { %535 = vmatpush3.msra.mxu0 %v195_v17 }
  0x1b   :  { %536 = vmatprep.subr.mxu0 %v567_v0 }
  0x1c   :  { %537 = vmatpush3.msra.mxu0 %v194_v18 }
  0x1d   :  { %538 = vmatprep.subr.mxu0 %v567_v0 }
  0x1e   :  { %539 = vmatpush3.msra.mxu0 %v193_v19 }
  0x1f   :  { %540 = vmatprep.subr.mxu0 %v567_v0 }
  0x20   :  { %541 = vmatpush3.msra.mxu0 %v192_v20 }
  0x21   :  { %542 = vmatprep.subr.mxu0 %v567_v0 }
  0x22   :  { %543 = vmatpush3.msra.mxu0 %v191_v21 }
  0x23   :  { %544 = vmatprep.subr.mxu0 %v567_v0 }
  0x24   :  { %545 = vmatpush3.msra.mxu0 %v190_v22 }
  0xc5   :  { %v107_v26 = vpop.f32.mrf.mxu1 }
  0xc7   :  { %v506_v27 = vpop.f32.mrf.mxu1 }
  0xc9   :  { %v180_v29 = vpop.f32.mrf.mxu1 }
  0xca   :  { %v181_v30 = vadd.f32 %v180_v29, %v107_v26 }
  0xcb   :  { %v513_v31 = vpop.f32.mrf.mxu1 }
  0xcc   :  { %v188_v32 = vadd.f32 %v463_v28, %v181_v30 }
  0xcd   :  { %v356_v37 = vpop.f32.mrf.mxu1 }
  0xce   :  { %v189_v33 = vmax.f32 %v188_v32, 0.0 }
  0xcf   :  { %v553_v38 = vpop.f32.mrf.mxu1 }
  0xd0   :  { %547 = vmatmul.mubr.f32.vlgmr.msra.gmra.mxu0 %v189_v33 }
 0x190   :  { %v276_v40 = vpop.f32.mrf.mxu0 }
 0x191   :  { %v277_v41 = vadd.f32 %v464_v39, %v276_v40 }
 0x192   :  { %v548_v42 = vpop.f32.mrf.mxu0 }
 0x193   :  { %v280_v43 = vmax.f32 %v277_v41, 0.0 }
 0x195   :  { %563 = vmatmul.mubr.msk.f32.vlgmr.msra.gmra.mxu1 %vm360_vm3, %v280_v43 }
 0x255   :  { %v430_v45 = vpop.f32.mrf.mxu1 }
 0x256   :  { %v431_v46 = vadd.f32 %v430_v45, %v356_v37 }
 0x257   :  { %v564_v47 = vpop.f32.mrf.mxu1 }
 0x258   :  { %v438_v48 = vadd.f32 %v467_v44, %v431_v46 }
 0x25a   :  { %v439_v50 = vmax.f32 %v438_v48, 0.0 }
 0x25c   :  { %v445_v51 = vmul.f32 %v468_v49, %v439_v50 }
 0x25e   :  { %v447_v52 = vsel %vm446_vm4, %v445_v51, 0.0 }
 0x25f   :  { %448 = vadd.xlane.f32.xlu0 %v447_v52 }
 0x2e8   :  { %v449_v54 = vpop.xlane.xlu0 %448 }
 0x2e9   :  { %v454_v55 = vadd.f32 %v469_v53, %v449_v54 }
 0x2eb   :  { %456 = vst.msk [vmem:[%s755_s7] sm:$0xff] %vm455_vm5, %v454_v55 }

</bundles_post_ra>
